<compile_context>
chip_gen: v7x
topology: tpu7x:2x2x1
jax: 0.10.0
libtpu: 0.0.40
codegen_flags: <defaults>
</compile_context>

<pallas_src>
import jax
import jax.numpy as jnp
from jax.experimental import pallas as pl
from jax.experimental.pallas import tpu as pltpu


# ---------------------------------------------------------------------------
# Kernel
# ---------------------------------------------------------------------------
def _packed_mlp_kernel(obs_ref, w_ref, b_ref, out_ref):
    """Packed-ensemble MLP forward.

    obs_ref: (B, obs_dim) f32
    w_ref:   (L, D, D)    f32  -- packed (block-diagonal) per-layer weights
    b_ref:   (L, 1, D)    f32  -- packed per-layer biases
    out_ref: (B, 1)       f32  -- ensemble-mean value (mean folded into layer L-1)
    """
    num_layers = w_ref.shape[0]
    obs_dim = obs_ref.shape[1]

    # Layer 0: only the first obs_dim rows of w_ref[0] are populated, so slice
    # them statically instead of padding obs per call.
    h = jnp.dot(
        obs_ref[...], w_ref[0, :obs_dim, :], preferred_element_type=jnp.float32
    ) + b_ref[0]
    h = jnp.maximum(h, 0.0)

    # Hidden layers: block-diagonal weights keep critics independent.  Padded
    # lanes stay exactly 0 through matmul+bias+ReLU, so results are exact.
    for layer in range(1, num_layers - 1):
        h = jnp.dot(h, w_ref[layer], preferred_element_type=jnp.float32) + b_ref[layer]
        h = jnp.maximum(h, 0.0)

    # Final layer: 1/C ensemble mean folded into column 0 of the packed weight.
    h = jnp.dot(
        h, w_ref[num_layers - 1], preferred_element_type=jnp.float32
    ) + b_ref[num_layers - 1]

    out_ref[...] = h[:, :1]


# ---------------------------------------------------------------------------
# One-time parameter packing (call at init / after every param update)
# ---------------------------------------------------------------------------
def pack_ensemble_params(weights, biases, lane_multiple=128):
    """Pack per-critic params into one (block-diagonal) matmul per layer.

    weights[l]: (C, in_l, out_l),  biases[l]: (C, 1, out_l)
    returns packed_w: (L, D, D) f32, packed_b: (L, 1, D) f32
    The 1/C ensemble mean is folded into the final layer (column 0).
    """
    num_layers = len(weights)
    num_critics = weights[0].shape[0]
    obs_dim = weights[0].shape[1]
    out_widths = [weights[l].shape[2] for l in range(num_layers)]

    packed_widths = [num_critics * w for w in out_widths[:-1]] + [1]
    d = max([obs_dim] + packed_widths)
    d = ((d + lane_multiple - 1) // lane_multiple) * lane_multiple  # lane-pad

    packed_w = jnp.zeros((num_layers, d, d), jnp.float32)
    packed_b = jnp.zeros((num_layers, 1, d), jnp.float32)
    inv_c = 1.0 / float(num_critics)

    for l in range(num_layers):
        in_l = weights[l].shape[1]
        out_l = out_widths[l]
        last = l == num_layers - 1
        for c in range(num_critics):
            row0 = 0 if l == 0 else c * in_l           # obs is shared at layer 0
            col0 = 0 if last else c * out_l            # mean folded at final layer
            w_c = weights[l][c].astype(jnp.float32)
            b_c = biases[l][c].astype(jnp.float32)
            if last:
                w_c = w_c * inv_c
                b_c = b_c * inv_c
            packed_w = packed_w.at[l, row0:row0 + in_l, col0:col0 + out_l].set(w_c)
            if last:
                packed_b = packed_b.at[l, :, col0:col0 + out_l].add(b_c)
            else:
                packed_b = packed_b.at[l, :, col0:col0 + out_l].set(b_c)
    return packed_w, packed_b


# ---------------------------------------------------------------------------
# Forward (jit this; takes pre-packed params)
# ---------------------------------------------------------------------------
def ensemble_value_forward(obs, packed_w, packed_b):
    """obs: (B, obs_dim) f32 -> (B,) f32 ensemble-mean value."""
    batch = obs.shape[0]
    values = pl.pallas_call(
        _packed_mlp_kernel,
        out_shape=jax.ShapeDtypeStruct((batch, 1), jnp.float32),
        in_specs=[
            pl.BlockSpec(memory_space=pltpu.MemorySpace.VMEM),  # obs
            pl.BlockSpec(memory_space=pltpu.MemorySpace.VMEM),  # packed_w
            pl.BlockSpec(memory_space=pltpu.MemorySpace.VMEM),  # packed_b
        ],
        out_specs=pl.BlockSpec(memory_space=pltpu.MemorySpace.VMEM),
    )(obs, packed_w, packed_b)
    return values[:, 0]


# TODO(synk): if batch grows (RL rollouts), add a "parallel" batch grid axis
# (TILE_B multiple of 8, constant weight index_map) so the pipeline and v7x's
# second TensorCore are used; size TILE_B against v7x's 64 MiB VMEM.


# ---------------------------------------------------------------------------
# Init + pure-JAX reference
# ---------------------------------------------------------------------------
def init_ensemble_params(key, obs_dim, hidden_sizes, num_critics):
    """Deterministic PyTorch-Linear-style init (uniform +/- 1/sqrt(fan_in))."""
    sizes = [obs_dim] + list(hidden_sizes) + [1]
    weights, biases = [], []
    for l in range(len(sizes) - 1):
        in_f, out_f = sizes[l], sizes[l + 1]
        key, kw, kb = jax.random.split(key, 3)
        bound = 1.0 / jnp.sqrt(jnp.float32(in_f))
        w = jax.random.uniform(
            kw, (num_critics, in_f, out_f), jnp.float32, -bound, bound
        )
        b = jax.random.uniform(
            kb, (num_critics, 1, out_f), jnp.float32, -bound, bound
        )
        weights.append(w)
        biases.append(b)
    return weights, biases


def reference_forward(obs, weights, biases):
    """Pure-JAX reference matching the PyTorch module semantics."""
    num_critics = weights[0].shape[0]
    vals = []
    for c in range(num_critics):
        h = obs
        for l in range(len(weights)):
            h = h @ weights[l][c] + biases[l][c]
            if l < len(weights) - 1:
                h = jnp.maximum(h, 0.0)
        vals.append(h.squeeze(-1))
    return jnp.stack(vals, axis=0).mean(axis=0)


if __name__ == "__main__":
    # Small shapes: batch=8, obs_dim=32, hidden_sizes=[32, 32], 5 critics.
    batch = 8
    obs_dim = 32
    hidden_sizes = [32, 32]
    num_critics = 5

    key = jax.random.PRNGKey(0)
    key, obs_key = jax.random.split(key)
    obs = jax.random.normal(obs_key, (batch, obs_dim), dtype=jnp.float32)

    weights, biases = init_ensemble_params(key, obs_dim, hidden_sizes, num_critics)

    # Packing happens ONCE, outside the forward path.
    packed_w, packed_b = pack_ensemble_params(weights, biases)
    packed_w = jax.block_until_ready(packed_w)
    packed_b = jax.block_until_ready(packed_b)

    forward = jax.jit(ensemble_value_forward)
    out = jax.block_until_ready(forward(obs, packed_w, packed_b))

    ref = reference_forward(obs, weights, biases)
    assert out.shape == (batch,)
    assert jnp.allclose(out, ref, atol=1e-5, rtol=1e-5), (out, ref)

    print("KERNEL_OK")
</pallas_src>

<mosaic_0001>
module attributes {stable_mosaic.version = 11 : i64} {
  func.func @_packed_mlp_kernel(%arg0: memref<8x32xf32, #tpu.memory_space<vmem>>, %arg1: memref<3x256x256xf32, #tpu.memory_space<vmem>>, %arg2: memref<3x1x256xf32, #tpu.memory_space<vmem>>, %arg3: memref<8x1xf32, #tpu.memory_space<vmem>>) attributes {dimension_semantics = [], scalar_prefetch = 0 : i64, scratch_operands = 0 : i64, tpu.core_type = #tpu.core_type<tc>} {
    %c0 = arith.constant 0 : index
    %c0_0 = arith.constant 0 : index
    %0 = vector.load %arg0[%c0, %c0_0] : memref<8x32xf32, #tpu.memory_space<vmem>>, vector<8x32xf32>
    %c0_1 = arith.constant 0 : index
    %c0_2 = arith.constant 0 : index
    %c0_3 = arith.constant 0 : index
    %1 = vector.load %arg1[%c0_1, %c0_2, %c0_3] : memref<3x256x256xf32, #tpu.memory_space<vmem>>, vector<1x32x256xf32>
    %2 = vector.shape_cast %1 : vector<1x32x256xf32> to vector<32x256xf32>
    %cst = arith.constant dense<0.000000e+00> : vector<8x256xf32>
    %3 = tpu.matmul %0, %2, %cst {dimension_numbers = #tpu.dot_dimension_numbers<[1], [0], [0], [1], [0, 0, 1, 1], [], []>} : vector<8x32xf32>, vector<32x256xf32>, vector<8x256xf32> -> vector<8x256xf32>
    %c0_4 = arith.constant 0 : index
    %c0_5 = arith.constant 0 : index
    %c0_6 = arith.constant 0 : index
    %4 = vector.load %arg2[%c0_4, %c0_5, %c0_6] : memref<3x1x256xf32, #tpu.memory_space<vmem>>, vector<1x1x256xf32>
    %5 = vector.shape_cast %4 : vector<1x1x256xf32> to vector<1x256xf32>
    %6 = vector.broadcast %5 : vector<1x256xf32> to vector<8x256xf32>
    %7 = arith.addf %3, %6 : vector<8x256xf32>
    %cst_7 = arith.constant 0.000000e+00 : f32
    %8 = vector.broadcast %cst_7 : f32 to vector<8x256xf32>
    %9 = arith.maximumf %7, %8 : vector<8x256xf32>
    %c1 = arith.constant 1 : index
    %c0_8 = arith.constant 0 : index
    %c0_9 = arith.constant 0 : index
    %10 = vector.load %arg1[%c1, %c0_8, %c0_9] : memref<3x256x256xf32, #tpu.memory_space<vmem>>, vector<1x256x256xf32>
    %11 = vector.shape_cast %10 : vector<1x256x256xf32> to vector<256x256xf32>
    %cst_10 = arith.constant dense<0.000000e+00> : vector<8x256xf32>
    %12 = tpu.matmul %9, %11, %cst_10 {dimension_numbers = #tpu.dot_dimension_numbers<[1], [0], [0], [1], [0, 0, 1, 1], [], []>} : vector<8x256xf32>, vector<256x256xf32>, vector<8x256xf32> -> vector<8x256xf32>
    %c1_11 = arith.constant 1 : index
    %c0_12 = arith.constant 0 : index
    %c0_13 = arith.constant 0 : index
    %13 = vector.load %arg2[%c1_11, %c0_12, %c0_13] : memref<3x1x256xf32, #tpu.memory_space<vmem>>, vector<1x1x256xf32>
    %14 = vector.shape_cast %13 : vector<1x1x256xf32> to vector<1x256xf32>
    %15 = vector.broadcast %14 : vector<1x256xf32> to vector<8x256xf32>
    %16 = arith.addf %12, %15 : vector<8x256xf32>
    %cst_14 = arith.constant 0.000000e+00 : f32
    %17 = vector.broadcast %cst_14 : f32 to vector<8x256xf32>
    %18 = arith.maximumf %16, %17 : vector<8x256xf32>
    %c2 = arith.constant 2 : index
    %c0_15 = arith.constant 0 : index
    %c0_16 = arith.constant 0 : index
    %19 = vector.load %arg1[%c2, %c0_15, %c0_16] : memref<3x256x256xf32, #tpu.memory_space<vmem>>, vector<1x256x256xf32>
    %20 = vector.shape_cast %19 : vector<1x256x256xf32> to vector<256x256xf32>
    %cst_17 = arith.constant dense<0.000000e+00> : vector<8x256xf32>
    %21 = tpu.matmul %18, %20, %cst_17 {dimension_numbers = #tpu.dot_dimension_numbers<[1], [0], [0], [1], [0, 0, 1, 1], [], []>} : vector<8x256xf32>, vector<256x256xf32>, vector<8x256xf32> -> vector<8x256xf32>
    %c2_18 = arith.constant 2 : index
    %c0_19 = arith.constant 0 : index
    %c0_20 = arith.constant 0 : index
    %22 = vector.load %arg2[%c2_18, %c0_19, %c0_20] : memref<3x1x256xf32, #tpu.memory_space<vmem>>, vector<1x1x256xf32>
    %23 = vector.shape_cast %22 : vector<1x1x256xf32> to vector<1x256xf32>
    %24 = vector.broadcast %23 : vector<1x256xf32> to vector<8x256xf32>
    %25 = arith.addf %21, %24 : vector<8x256xf32>
    %26 = vector.extract_strided_slice %25 {offsets = [0, 0], sizes = [8, 1], strides = [1, 1]} : vector<8x256xf32> to vector<8x1xf32>
    %c0_21 = arith.constant 0 : index
    %c0_22 = arith.constant 0 : index
    %27 = vector.load %arg3[%c0_21, %c0_22] : memref<8x1xf32, #tpu.memory_space<vmem>>, vector<8x1xf32>
    tpu.vector_store %arg3[%c0_21, %c0_22], %26 {strides = array<i32>} : memref<8x1xf32, #tpu.memory_space<vmem>>, vector<8x1xf32>,
    return
  }
}

</mosaic_0001>

<bundles_post_ra>
// kernel: ensemble_value_forward.1
= control target key start
LH: loop header
LB: loop body
LE: loop exit
PB: predicated region body
PF: predicated region fallthrough
CT: control target
= control target key end

     0   :  { %8 = vsyncpa [#allocation3], 0  ;;  %s700_s0 = inlined_call_operand.hbm [shape: f32[8,32], index: 0, kind: input, shape index: {}]   ;;  %s701_s1 = inlined_call_operand.hbm [shape: f32[3,256,256], index: 1, kind: input, shape index: {}]   ;;  %s702_s2 = inlined_call_operand.vmem [shape: f32[3,1,256], index: 2, kind: input, shape index: {}]   ;;  %s703_s3 = inlined_call_operand.vmem [shape: f32[8,1], index: 3, kind: output, shape index: {}]  }
   0x1   :  { %9 = vsyncpa [#allocation5], 0  ;;  %s632_s12 = smov [#allocation2]   ;;  %s633_s14 = smov [#allocation4]  }
   0x2   :  { %s16_s13 = sshll.u32 %s632_s12, 4  ;;  %s25_s15 = sshll.u32 %s633_s14, 4  ;;  %s17_s13 = int_to_ptr.vmem [resolvable:$true] %s16_s13  ;;  %s657_s15 = int_to_ptr.vmem [resolvable:$true] %s25_s15 }
   0x3   :  { %s584_s18 = scalar_lea.hbm %s700_s0, 128 }
   0x4   :  { %p585_p0 = scmp.ne.s32.totalorder %s700_s0, %s584_s18  ;;  %p588_p1 = scmp.lt.u32.totalorder %s584_s18, %s700_s0 }
   0x6   :  { %p590_p2 = pnand %p588_p1, %p585_p0 }
   0x8   :  { %593 = shalt.err (!%p590_p2)
}
   0x9   :  { %s594_s23 = scalar_lea.vmem %s17_s13, 128  ;;  %p599_p4 = scmp.lt.s32.totalorder %s17_s13, %s17_s13 }
   0xa   :  { %p595_p3 = scmp.ne.s32.totalorder %s17_s13, %s594_s23  ;;  %p600_p5 = scmp.lt.s32.totalorder %s594_s23, %s594_s23 }
   0xc   :  { %p601_p6 = por %p600_p5, %p599_p4 }
   0xe   :  { %p602_p7 = pnand %p601_p6, %p595_p3 }
  0x10   :  { %605 = shalt.err (!%p602_p7)
}
  0x11   :  { %19 = dma.hbm_to_vmem [thread:$0]  %s700_s0, 128, %s17_s13, [#allocation3]  }
  0x12   :  { %s606_s28 = scalar_lea.hbm %s701_s1, 24576 }
  0x13   :  { %p607_p8 = scmp.ne.s32.totalorder %s701_s1, %s606_s28  ;;  %p610_p9 = scmp.lt.u32.totalorder %s606_s28, %s701_s1 }
  0x15   :  { %p612_p10 = pnand %p610_p9, %p607_p8 }
  0x17   :  { %615 = shalt.err (!%p612_p10)
}
  0x18   :  { %s616_s6 = scalar_lea.vmem %s657_s15, 24576  ;;  %p621_p12 = scmp.lt.s32.totalorder %s657_s15, %s657_s15 }
  0x19   :  { %p617_p11 = scmp.ne.s32.totalorder %s657_s15, %s616_s6  ;;  %p622_p13 = scmp.lt.s32.totalorder %s616_s6, %s616_s6 }
  0x1b   :  { %p623_p0 = por %p622_p13, %p621_p12 }
  0x1d   :  { %p624_p1 = pnand %p623_p0, %p617_p11 }
  0x1f   :  { %627 = shalt.err (!%p624_p1)
}
  0x20   :  { %s634_s0 = smov 256   ;;  %s635_s7 = smov 16  }
  0x21   :  { %31 = dma.hbm_to_vmem [thread:$0]  %s701_s1, 24576, %s657_s15, [#allocation5], %s634_s0, %s634_s0, %s635_s7  }
  0x22   :  { %628 = dma.done.wait [#allocation3], 128  }
  0x23   :  { %629 = vsyncadd [#allocation3], 4294967168 }
  0x24   :  { %630 = dma.done.wait [#allocation5], 24576  }
  0x25   :  { %631 = vsyncadd [#allocation5], 4294942720  ;;  %v636_v0 = vmov 0.0   ;;  %v42_v1 = vld [vmem:[#allocation4 + $0x8] sm:$0xff]  ;;  %v44_v2 = vld [vmem:[#allocation4 + $0x18] sm:$0xff]  ;;  %vm61_vm0 = vcmask 261120  }
  0x26   :  { %129 = vmatprep.mubr.f32.mxu0 %v636_v0  ;;  %v41_v3 = vld [vmem:[#allocation4] sm:$0xff]  ;;  %v443_v4 = vpack.c.bf16 %v44_v2, %v42_v1  ;;  %v43_v5 = vld [vmem:[#allocation4 + $0x10] sm:$0xff]  ;;  %v46_v6 = vld [vmem:[#allocation4 + $0x28] sm:$0xff]  ;;  %vm432_vm1 = vcmask 7168  }
  0x27   :  { %v48_v7 = vld [vmem:[#allocation4 + $0x38] sm:$0xff]  ;;  %v445_v8 = vpack.c.bf16 %v43_v5, %v41_v3  ;;  %v45_v10 = vld [vmem:[#allocation4 + $0x20] sm:$0xff]  ;;  %v47_v11 = vld [vmem:[#allocation4 + $0x30] sm:$0xff] }
  0x28   :  { %v447_v9 = vpack.c.bf16 %v48_v7, %v46_v6  ;;  %444 = vmatprep.subr.bf16.mxu0 %v443_v4  ;;  %v140_v12 = vld [vmem:[#allocation4 + $0x208] sm:$0xff]  ;;  %v142_v13 = vld [vmem:[#allocation4 + $0x218] sm:$0xff]  ;;  %v139_v14 = vld [vmem:[#allocation4 + $0x200] sm:$0xff]  ;;  %v449_v15 = vpack.c.bf16 %v47_v11, %v45_v10 }
  0x29   :  { %446 = vmatpush1.bf16.msra.mxu0 %v445_v8  ;;  %v451_v16 = vpack.c.bf16 %v142_v13, %v140_v12  ;;  %v141_v17 = vld [vmem:[#allocation4 + $0x210] sm:$0xff]  ;;  %v144_v18 = vld [vmem:[#allocation4 + $0x228] sm:$0xff]  ;;  %v146_v19 = vld [vmem:[#allocation4 + $0x238] sm:$0xff] }
  0x2a   :  { %448 = vmatprep.subr.bf16.mxu0 %v447_v9  ;;  %v453_v20 = vpack.c.bf16 %v141_v17, %v139_v14  ;;  %v455_v21 = vpack.c.bf16 %v146_v19, %v144_v18  ;;  %v143_v22 = vld [vmem:[#allocation4 + $0x220] sm:$0xff]  ;;  %v145_v23 = vld [vmem:[#allocation4 + $0x230] sm:$0xff]  ;;  %v148_v24 = vld [vmem:[#allocation4 + $0x248] sm:$0xff] }
  0x2b   :  { %452 = vmatprep.subr.bf16.mxu1 %v451_v16  ;;  %v150_v25 = vld [vmem:[#allocation4 + $0x258] sm:$0xff]  ;;  %v457_v26 = vpack.c.bf16 %v145_v23, %v143_v22  ;;  %v147_v29 = vld [vmem:[#allocation4 + $0x240] sm:$0xff]  ;;  %v149_v30 = vld [vmem:[#allocation4 + $0x250] sm:$0xff] }
  0x2c   :  { %454 = vmatpush1.bf16.msra.mxu1 %v453_v20  ;;  %v40_v27 = vld [vmem:[#allocation2] sm:$0xff]  ;;  %v459_v28 = vpack.c.bf16 %v150_v25, %v148_v24  ;;  %v152_v31 = vld [vmem:[#allocation4 + $0x268] sm:$0xff]  ;;  %v461_v33 = vpack.c.bf16 %v149_v30, %v147_v29  ;;  %v151_v35 = vld [vmem:[#allocation4 + $0x260] sm:$0xff] }
  0x2d   :  { %450 = vmatpush1.bf16.msra.mxu0 %v449_v15  ;;  %456 = vmatprep.subr.bf16.mxu1 %v455_v21  ;;  %v154_v32 = vld [vmem:[#allocation4 + $0x278] sm:$0xff]  ;;  %v153_v36 = vld [vmem:[#allocation4 + $0x270] sm:$0xff]  ;;  %v156_v37 = vld [vmem:[#allocation4 + $0x288] sm:$0xff] }
  0x2e   :  { %v463_v34 = vpack.c.bf16 %v154_v32, %v152_v31  ;;  %v158_v38 = vld [vmem:[#allocation4 + $0x298] sm:$0xff]  ;;  %v465_v39 = vpack.c.bf16 %v153_v36, %v151_v35  ;;  %v155_v41 = vld [vmem:[#allocation4 + $0x280] sm:$0xff]  ;;  %v157_v42 = vld [vmem:[#allocation4 + $0x290] sm:$0xff] }
  0x2f   :  { %v467_v40 = vpack.c.bf16 %v158_v38, %v156_v37  ;;  %v160_v43 = vld [vmem:[#allocation4 + $0x2a8] sm:$0xff]  ;;  %v162_v44 = vld [vmem:[#allocation4 + $0x2b8] sm:$0xff]  ;;  %v469_v45 = vpack.c.bf16 %v157_v42, %v155_v41  ;;  %v159_v47 = vld [vmem:[#allocation4 + $0x2a0] sm:$0xff] }
  0x30   :  { %440 = vmatmul.mubr.msk.f32.vlgmr.msra.gmra.mrb[0].mxu0 %vm61_vm0, %v40_v27  ;;  %458 = vmatpush1.bf16.msra.mxu1 %v457_v26  ;;  %v471_v46 = vpack.c.bf16 %v162_v44, %v160_v43  ;;  %v161_v48 = vld [vmem:[#allocation4 + $0x2b0] sm:$0xff]  ;;  %v164_v49 = vld [vmem:[#allocation4 + $0x2c8] sm:$0xff]  ;;  %v166_v50 = vld [vmem:[#allocation4 + $0x2d8] sm:$0xff] }
  0x31   :  { %460 = vmatprep.subr.bf16.mxu1 %v459_v28  ;;  %v473_v51 = vpack.c.bf16 %v161_v48, %v159_v47  ;;  %v475_v52 = vpack.c.bf16 %v166_v50, %v164_v49  ;;  %v163_v53 = vld [vmem:[#allocation4 + $0x2c0] sm:$0xff]  ;;  %v165_v54 = vld [vmem:[#allocation4 + $0x2d0] sm:$0xff]  ;;  %v168_v55 = vld [vmem:[#allocation4 + $0x2e8] sm:$0xff] }
  0x32   :  { %v170_v56 = vld [vmem:[#allocation4 + $0x2f8] sm:$0xff]  ;;  %v477_v57 = vpack.c.bf16 %v165_v54, %v163_v53  ;;  %v167_v59 = vld [vmem:[#allocation4 + $0x2e0] sm:$0xff]  ;;  %v169_v60 = vld [vmem:[#allocation4 + $0x2f0] sm:$0xff] }
  0x33   :  { %v479_v58 = vpack.c.bf16 %v170_v56, %v168_v55  ;;  %v172_v61 = vld [vmem:[#allocation4 + $0x308] sm:$0xff]  ;;  %v174_v62 = vld [vmem:[#allocation4 + $0x318] sm:$0xff]  ;;  %v481_v63 = vpack.c.bf16 %v169_v60, %v167_v59  ;;  %v171_v1 = vld [vmem:[#allocation4 + $0x300] sm:$0xff] }
  0x34   :  { %462 = vmatpush1.bf16.msra.mxu1 %v461_v33  ;;  %v483_v0 = vpack.c.bf16 %v174_v62, %v172_v61  ;;  %v173_v2 = vld [vmem:[#allocation4 + $0x310] sm:$0xff]  ;;  %v176_v3 = vld [vmem:[#allocation4 + $0x328] sm:$0xff]  ;;  %v178_v4 = vld [vmem:[#allocation4 + $0x338] sm:$0xff] }
  0x35   :  { %464 = vmatprep.subr.bf16.mxu1 %v463_v34  ;;  %v485_v5 = vpack.c.bf16 %v173_v2, %v171_v1  ;;  %v487_v6 = vpack.c.bf16 %v178_v4, %v176_v3  ;;  %v175_v7 = vld [vmem:[#allocation4 + $0x320] sm:$0xff]  ;;  %v177_v8 = vld [vmem:[#allocation4 + $0x330] sm:$0xff]  ;;  %v180_v9 = vld [vmem:[#allocation4 + $0x348] sm:$0xff] }
  0x36   :  { %v182_v10 = vld [vmem:[#allocation4 + $0x358] sm:$0xff]  ;;  %v489_v11 = vpack.c.bf16 %v177_v8, %v175_v7  ;;  %v179_v13 = vld [vmem:[#allocation4 + $0x340] sm:$0xff]  ;;  %v181_v14 = vld [vmem:[#allocation4 + $0x350] sm:$0xff] }
  0x37   :  { %v491_v12 = vpack.c.bf16 %v182_v10, %v180_v9  ;;  %v184_v15 = vld [vmem:[#allocation4 + $0x368] sm:$0xff]  ;;  %v186_v16 = vld [vmem:[#allocation4 + $0x378] sm:$0xff]  ;;  %v493_v17 = vpack.c.bf16 %v181_v14, %v179_v13  ;;  %v183_v19 = vld [vmem:[#allocation4 + $0x360] sm:$0xff] }
  0x38   :  { %466 = vmatpush1.bf16.msra.mxu1 %v465_v39  ;;  %v495_v18 = vpack.c.bf16 %v186_v16, %v184_v15  ;;  %v185_v20 = vld [vmem:[#allocation4 + $0x370] sm:$0xff]  ;;  %v188_v21 = vld [vmem:[#allocation4 + $0x388] sm:$0xff]  ;;  %v190_v22 = vld [vmem:[#allocation4 + $0x398] sm:$0xff] }
  0x39   :  { %468 = vmatprep.subr.bf16.mxu1 %v467_v40  ;;  %v497_v23 = vpack.c.bf16 %v185_v20, %v183_v19  ;;  %v499_v24 = vpack.c.bf16 %v190_v22, %v188_v21  ;;  %v187_v25 = vld [vmem:[#allocation4 + $0x380] sm:$0xff]  ;;  %v189_v26 = vld [vmem:[#allocation4 + $0x390] sm:$0xff]  ;;  %v192_v27 = vld [vmem:[#allocation4 + $0x3a8] sm:$0xff] }
  0x3a   :  { %v194_v28 = vld [vmem:[#allocation4 + $0x3b8] sm:$0xff]  ;;  %v501_v29 = vpack.c.bf16 %v189_v26, %v187_v25  ;;  %v191_v31 = vld [vmem:[#allocation4 + $0x3a0] sm:$0xff]  ;;  %v193_v32 = vld [vmem:[#allocation4 + $0x3b0] sm:$0xff] }
  0x3b   :  { %v503_v30 = vpack.c.bf16 %v194_v28, %v192_v27  ;;  %v196_v33 = vld [vmem:[#allocation4 + $0x3c8] sm:$0xff]  ;;  %v198_v34 = vld [vmem:[#allocation4 + $0x3d8] sm:$0xff]  ;;  %v505_v35 = vpack.c.bf16 %v193_v32, %v191_v31  ;;  %v195_v37 = vld [vmem:[#allocation4 + $0x3c0] sm:$0xff] }
  0x3c   :  { %470 = vmatpush1.bf16.msra.mxu1 %v469_v45  ;;  %v507_v36 = vpack.c.bf16 %v198_v34, %v196_v33  ;;  %v197_v38 = vld [vmem:[#allocation4 + $0x3d0] sm:$0xff]  ;;  %v200_v40 = vld [vmem:[#allocation4 + $0x3e8] sm:$0xff]  ;;  %v202_v41 = vld [vmem:[#allocation4 + $0x3f8] sm:$0xff] }
  0x3d   :  { %472 = vmatprep.subr.bf16.mxu1 %v471_v46  ;;  %v509_v39 = vpack.c.bf16 %v197_v38, %v195_v37  ;;  %v511_v42 = vpack.c.bf16 %v202_v41, %v200_v40  ;;  %v199_v43 = vld [vmem:[#allocation4 + $0x3e0] sm:$0xff]  ;;  %v201_v44 = vld [vmem:[#allocation4 + $0x3f0] sm:$0xff]  ;;  %v291_v46 = vld [vmem:[#allocation4 + $0x408] sm:$0xff] }
  0x3e   :  { %v513_v45 = vpack.c.bf16 %v201_v44, %v199_v43  ;;  %v293_v47 = vld [vmem:[#allocation4 + $0x418] sm:$0xff]  ;;  %v290_v48 = vld [vmem:[#allocation4 + $0x400] sm:$0xff]  ;;  %v292_v50 = vld [vmem:[#allocation4 + $0x410] sm:$0xff] }
  0x3f   :  { %v515_v49 = vpack.c.bf16 %v293_v47, %v291_v46  ;;  %v517_v53 = vpack.c.bf16 %v292_v50, %v290_v48  ;;  %v294_v55 = vld [vmem:[#allocation4 + $0x420] sm:$0xff]  ;;  %v296_v56 = vld [vmem:[#allocation4 + $0x430] sm:$0xff]  ;;  %v331_v41 = vld [vmem:[#allocation4 + $0x548] sm:$0xff] }
  0x40   :  { %474 = vmatpush1.bf16.msra.mxu1 %v473_v51  ;;  %v295_v51 = vld [vmem:[#allocation4 + $0x428] sm:$0xff]  ;;  %v521_v59 = vpack.c.bf16 %v296_v56, %v294_v55  ;;  %v298_v61 = vld [vmem:[#allocation4 + $0x440] sm:$0xff]  ;;  %v300_v62 = vld [vmem:[#allocation4 + $0x450] sm:$0xff] }
  0x41   :  { %476 = vmatprep.subr.bf16.mxu1 %v475_v52  ;;  %v297_v52 = vld [vmem:[#allocation4 + $0x438] sm:$0xff]  ;;  %516 = vmatprep.subr.bf16.mxu0 %v515_v49  ;;  %v525_v1 = vpack.c.bf16 %v300_v62, %v298_v61  ;;  %v302_v3 = vld [vmem:[#allocation4 + $0x460] sm:$0xff]  ;;  %v304_v4 = vld [vmem:[#allocation4 + $0x470] sm:$0xff] }
  0x42   :  { %v519_v54 = vpack.c.bf16 %v297_v52, %v295_v51  ;;  %518 = vmatpush1.bf16.msra.mxu0 %v517_v53  ;;  %v529_v7 = vpack.c.bf16 %v304_v4, %v302_v3  ;;  %v306_v9 = vld [vmem:[#allocation4 + $0x480] sm:$0xff]  ;;  %v308_v10 = vld [vmem:[#allocation4 + $0x490] sm:$0xff]  ;;  %v335_v47 = vld [vmem:[#allocation4 + $0x568] sm:$0xff] }
  0x43   :  { %v533_v13 = vpack.c.bf16 %v308_v10, %v306_v9  ;;  %v310_v15 = vld [vmem:[#allocation4 + $0x4a0] sm:$0xff]  ;;  %v312_v16 = vld [vmem:[#allocation4 + $0x4b0] sm:$0xff]  ;;  %v337_v48 = vld [vmem:[#allocation4 + $0x578] sm:$0xff] }
  0x44   :  { %478 = vmatpush1.bf16.msra.mxu1 %v477_v57  ;;  %v299_v57 = vld [vmem:[#allocation4 + $0x448] sm:$0xff]  ;;  %520 = vmatprep.subr.bf16.mxu0 %v519_v54  ;;  %v537_v19 = vpack.c.bf16 %v312_v16, %v310_v15  ;;  %v314_v21 = vld [vmem:[#allocation4 + $0x4c0] sm:$0xff]  ;;  %v316_v22 = vld [vmem:[#allocation4 + $0x4d0] sm:$0xff]  ;;  %v559_v50 = vpack.c.bf16 %v337_v48, %v335_v47 }
  0x45   :  { %480 = vmatprep.subr.bf16.mxu1 %v479_v58  ;;  %v301_v58 = vld [vmem:[#allocation4 + $0x458] sm:$0xff]  ;;  %v541_v25 = vpack.c.bf16 %v316_v22, %v314_v21  ;;  %v318_v27 = vld [vmem:[#allocation4 + $0x4e0] sm:$0xff]  ;;  %v320_v28 = vld [vmem:[#allocation4 + $0x4f0] sm:$0xff] }
  0x46   :  { %v523_v60 = vpack.c.bf16 %v301_v58, %v299_v57  ;;  %522 = vmatpush1.bf16.msra.mxu0 %v521_v59  ;;  %v545_v31 = vpack.c.bf16 %v320_v28, %v318_v27  ;;  %v322_v33 = vld [vmem:[#allocation4 + $0x500] sm:$0xff]  ;;  %v324_v34 = vld [vmem:[#allocation4 + $0x510] sm:$0xff]  ;;  %v339_v53 = vld [vmem:[#allocation4 + $0x588] sm:$0xff] }
  0x47   :  { %v549_v37 = vpack.c.bf16 %v324_v34, %v322_v33  ;;  %v328_v40 = vld [vmem:[#allocation4 + $0x530] sm:$0xff]  ;;  %v334_v51 = vld [vmem:[#allocation4 + $0x560] sm:$0xff]  ;;  %v341_v54 = vld [vmem:[#allocation4 + $0x598] sm:$0xff] }
  0x48   :  { %482 = vmatpush1.bf16.msra.mxu1 %v481_v63  ;;  %v303_v63 = vld [vmem:[#allocation4 + $0x468] sm:$0xff]  ;;  %524 = vmatprep.subr.bf16.mxu0 %v523_v60  ;;  %v332_v46 = vld [vmem:[#allocation4 + $0x550] sm:$0xff]  ;;  %v563_v56 = vpack.c.bf16 %v341_v54, %v339_v53  ;;  %v338_v57 = vld [vmem:[#allocation4 + $0x580] sm:$0xff] }
  0x49   :  { %484 = vmatprep.subr.bf16.mxu1 %v483_v0  ;;  %v305_v0 = vld [vmem:[#allocation4 + $0x478] sm:$0xff]  ;;  %v336_v52 = vld [vmem:[#allocation4 + $0x570] sm:$0xff]  ;;  %v343_v59 = vld [vmem:[#allocation4 + $0x5a8] sm:$0xff] }
  0x4a   :  { %v527_v2 = vpack.c.bf16 %v305_v0, %v303_v63  ;;  %526 = vmatpush1.bf16.msra.mxu0 %v525_v1  ;;  %v561_v55 = vpack.c.bf16 %v336_v52, %v334_v51  ;;  %v340_v58 = vld [vmem:[#allocation4 + $0x590] sm:$0xff]  ;;  %v345_v60 = vld [vmem:[#allocation4 + $0x5b8] sm:$0xff]  ;;  %v342_v63 = vld [vmem:[#allocation4 + $0x5a0] sm:$0xff] }
  0x4b   :  { %v565_v61 = vpack.c.bf16 %v340_v58, %v338_v57  ;;  %v567_v62 = vpack.c.bf16 %v345_v60, %v343_v59  ;;  %v344_v0 = vld [vmem:[#allocation4 + $0x5b0] sm:$0xff]  ;;  %v347_v1 = vld [vmem:[#allocation4 + $0x5c8] sm:$0xff]  ;;  %v353_v22 = vld [vmem:[#allocation4 + $0x5f8] sm:$0xff] }
  0x4c   :  { %486 = vmatpush1.bf16.msra.mxu1 %v485_v5  ;;  %v307_v5 = vld [vmem:[#allocation4 + $0x488] sm:$0xff]  ;;  %528 = vmatprep.subr.bf16.mxu0 %v527_v2  ;;  %v349_v2 = vld [vmem:[#allocation4 + $0x5d8] sm:$0xff]  ;;  %v569_v3 = vpack.c.bf16 %v344_v0, %v342_v63  ;;  %v441_v27 = vld [vmem:[%s702_s2 + $0x2] sm:$0x3] }
  0x4d   :  { %488 = vmatprep.subr.bf16.mxu1 %v487_v6  ;;  %v309_v6 = vld [vmem:[#allocation4 + $0x498] sm:$0xff]  ;;  %v571_v4 = vpack.c.bf16 %v349_v2, %v347_v1  ;;  %v351_v21 = vld [vmem:[#allocation4 + $0x5e8] sm:$0xff] }
  0x4e   :  { %v531_v8 = vpack.c.bf16 %v309_v6, %v307_v5  ;;  %530 = vmatpush1.bf16.msra.mxu0 %v529_v7  ;;  %v51_v5 = vlaneseq }
  0x50   :  { %490 = vmatpush1.bf16.msra.mxu1 %v489_v11  ;;  %v311_v11 = vld [vmem:[#allocation4 + $0x4a8] sm:$0xff]  ;;  %532 = vmatprep.subr.bf16.mxu0 %v531_v8  ;;  %v52_v6 = vshrl.u32 %v51_v5, 7  ;;  %v49_v8 = vld [vmem:[%s702_s2] sm:$0x3] }
  0x51   :  { %492 = vmatprep.subr.bf16.mxu1 %v491_v12  ;;  %v313_v12 = vld [vmem:[#allocation4 + $0x4b8] sm:$0xff] }
  0x52   :  { %v535_v14 = vpack.c.bf16 %v313_v12, %v311_v11  ;;  %534 = vmatpush1.bf16.msra.mxu0 %v533_v13  ;;  %v53_v7 = vsub.s32 0, %v52_v6  ;;  %v57_v9 = vsub.s32 1, %v52_v6 }
  0x54   :  { %494 = vmatpush1.bf16.msra.mxu1 %v493_v17  ;;  %v315_v17 = vld [vmem:[#allocation4 + $0x4c8] sm:$0xff]  ;;  %536 = vmatprep.subr.bf16.mxu0 %v535_v14  ;;  %v54_v10 = vrot.slane %v49_v8, %v53_v7  ;;  %v58_v11 = vrot.slane %v49_v8, %v57_v9  ;;  %v209_v28 = vrot.slane %v441_v27, %v53_v7 }
  0x55   :  { %496 = vmatprep.subr.bf16.mxu1 %v495_v18  ;;  %v317_v18 = vld [vmem:[#allocation4 + $0x4d8] sm:$0xff] }
  0x56   :  { %v539_v20 = vpack.c.bf16 %v317_v18, %v315_v17  ;;  %538 = vmatpush1.bf16.msra.mxu0 %v537_v19  ;;  %v346_v18 = vld [vmem:[#allocation4 + $0x5c0] sm:$0xff]  ;;  %v348_v19 = vld [vmem:[#allocation4 + $0x5d0] sm:$0xff] }
  0x58   :  { %498 = vmatpush1.bf16.msra.mxu1 %v497_v23  ;;  %v319_v23 = vld [vmem:[#allocation4 + $0x4e8] sm:$0xff]  ;;  %540 = vmatprep.subr.bf16.mxu0 %v539_v20  ;;  %v573_v20 = vpack.c.bf16 %v348_v19, %v346_v18 }
  0x59   :  { %500 = vmatprep.subr.bf16.mxu1 %v499_v24  ;;  %v321_v24 = vld [vmem:[#allocation4 + $0x4f8] sm:$0xff] }
  0x5a   :  { %v543_v26 = vpack.c.bf16 %v321_v24, %v319_v23  ;;  %542 = vmatpush1.bf16.msra.mxu0 %v541_v25  ;;  %v575_v23 = vpack.c.bf16 %v353_v22, %v351_v21  ;;  %v350_v24 = vld [vmem:[#allocation4 + $0x5e0] sm:$0xff]  ;;  %v352_v25 = vld [vmem:[#allocation4 + $0x5f0] sm:$0xff] }
  0x5c   :  { %502 = vmatpush1.bf16.msra.mxu1 %v501_v29  ;;  %v323_v29 = vld [vmem:[#allocation4 + $0x508] sm:$0xff]  ;;  %544 = vmatprep.subr.bf16.mxu0 %v543_v26  ;;  %v577_v26 = vpack.c.bf16 %v352_v25, %v350_v24 }
  0x5d   :  { %504 = vmatprep.subr.bf16.mxu1 %v503_v30  ;;  %v325_v30 = vld [vmem:[#allocation4 + $0x518] sm:$0xff] }
  0x5e   :  { %v547_v32 = vpack.c.bf16 %v325_v30, %v323_v29  ;;  %546 = vmatpush1.bf16.msra.mxu0 %v545_v31  ;;  %v213_v29 = vrot.slane %v441_v27, %v57_v9 }
  0x60   :  { %506 = vmatpush1.bf16.msra.mxu1 %v505_v35  ;;  %v327_v35 = vld [vmem:[#allocation4 + $0x528] sm:$0xff]  ;;  %548 = vmatprep.subr.bf16.mxu0 %v547_v32 }
  0x61   :  { %508 = vmatprep.subr.bf16.mxu1 %v507_v36  ;;  %v329_v36 = vld [vmem:[#allocation4 + $0x538] sm:$0xff] }
  0x62   :  { %v551_v38 = vpack.c.bf16 %v329_v36, %v327_v35  ;;  %550 = vmatpush1.bf16.msra.mxu0 %v549_v37  ;;  %v442_v36 = vld [vmem:[%s702_s2 + $0x4] sm:$0x3] }
  0x63   :  { %v360_v37 = vrot.slane %v442_v36, %v53_v7 }
  0x64   :  { %510 = vmatpush1.bf16.msra.mxu1 %v509_v39  ;;  %v326_v39 = vld [vmem:[#allocation4 + $0x520] sm:$0xff]  ;;  %552 = vmatprep.subr.bf16.mxu0 %v551_v38 }
  0x65   :  { %512 = vmatprep.subr.bf16.mxu1 %v511_v42  ;;  %v333_v42 = vld [vmem:[#allocation4 + $0x558] sm:$0xff]  ;;  %v553_v43 = vpack.c.bf16 %v328_v40, %v326_v39 }
  0x66   :  { %v555_v44 = vpack.c.bf16 %v333_v42, %v331_v41 }
  0x67   :  { %554 = vmatpush1.bf16.msra.mxu0 %v553_v43 }
  0x68   :  { %514 = vmatpush1.bf16.msra.mxu1 %v513_v45  ;;  %v330_v45 = vld [vmem:[#allocation4 + $0x540] sm:$0xff]  ;;  %556 = vmatprep.subr.bf16.mxu0 %v555_v44 }
  0x69   :  { %v557_v49 = vpack.c.bf16 %v332_v46, %v330_v45 }
  0x6b   :  { %558 = vmatpush1.bf16.msra.mxu0 %v557_v49 }
  0x6c   :  { %560 = vmatprep.subr.bf16.mxu0 %v559_v50 }
  0x6f   :  { %562 = vmatpush1.bf16.msra.mxu0 %v561_v55 }
  0x70   :  { %564 = vmatprep.subr.bf16.mxu0 %v563_v56 }
  0x73   :  { %566 = vmatpush1.bf16.msra.mxu0 %v565_v61 }
  0x74   :  { %568 = vmatprep.subr.bf16.mxu0 %v567_v62 }
  0x77   :  { %570 = vmatpush1.bf16.msra.mxu0 %v569_v3 }
  0x78   :  { %572 = vmatprep.subr.bf16.mxu0 %v571_v4 }
  0x7b   :  { %574 = vmatpush1.bf16.msra.mxu0 %v573_v20 }
  0x7c   :  { %576 = vmatprep.subr.bf16.mxu0 %v575_v23 }
  0x7f   :  { %578 = vmatpush1.bf16.msra.mxu0 %v577_v26 }
 0x103   :  { %v131_v12 = vpop.f32.mrb[0].mxu0 }
 0x104   :  { %v132_v13 = vadd.f32 %v131_v12, %v54_v10  ;;  %v133_v14 = vpop.f32.mrb[1].mxu0 }
 0x105   :  { %v134_v15 = vadd.f32 %v133_v14, %v58_v11 }
 0x106   :  { %v136_v17 = vmax.f32 %v132_v13, 0.0 }
 0x107   :  { %v137_v16 = vmax.f32 %v134_v15, 0.0 }
 0x109   :  { %280 = vmatprep.mubr.f32.mxu1 %v137_v16 }
 0x10a   :  { %281 = vmatmul.mubr.f32.vlgmr.msra.gmra.mrb[0].mxu1 %v136_v17 }
 0x1dd   :  { %v282_v30 = vpop.f32.mrb[0].mxu1 }
 0x1de   :  { %v283_v31 = vadd.f32 %v282_v30, %v209_v28  ;;  %v284_v32 = vpop.f32.mrb[1].mxu1 }
 0x1df   :  { %v285_v33 = vadd.f32 %v284_v32, %v213_v29 }
 0x1e0   :  { %v287_v35 = vmax.f32 %v283_v31, 0.0 }
 0x1e1   :  { %v288_v34 = vmax.f32 %v285_v33, 0.0 }
 0x1e3   :  { %426 = vmatprep.mubr.f32.mxu0 %v288_v34 }
 0x1e4   :  { %427 = vmatmul.mubr.f32.vlgmr.msra.gmra.mrb[2].mxu0 %v287_v35 }
 0x2b7   :  { %v428_v38 = vpop.f32.mrb[2].mxu0 }
 0x2b8   :  { %v429_v39 = vadd.f32 %v428_v38, %v360_v37  ;;  %v430_v40 = vpop.f32.mrb[3].mxu0 }
 0x2ba   :  { %433 = vst.msk [vmem:[%s703_s3] sm:$0xff] %vm432_vm1, %v429_v39 }
 0x2bb   :  { %438 = vsyncpa [#allocation3], 1 }
 0x2bc   :  { %439 = vsyncpa [#allocation5], 1 }

</bundles_post_ra>
